<compile_context>
chip_gen: v7x
topology: tpu7x:2x2x1
jax: 0.10.0
libtpu: 0.0.40
codegen_flags: <defaults>
</compile_context>

<pallas_src>
import jax
import jax.numpy as jnp
from jax import lax
from jax.experimental import pallas as pl
from jax.experimental.pallas import tpu as pltpu

SEQ = 8
BATCH = 1          # initHidden uses (1, 1, 60) -> batch must be 1
INPUT = 1          # input_size=1 (the hoisted x*W_ih broadcast relies on this)
HIDDEN = 60        # logical hidden size (torch)
HP = 64            # hidden padded to a lane-aligned 64
GW = 4 * HP        # fused gate width = 256

# Rows of the packed parameter slab (each row is GW lanes wide).
ROW_WIH, ROW_B, ROW_H0, ROW_C0, ROW_LOW, ROW_LOB = range(6)


def lstm_kernel(x_ref, whh_ref, par_ref, out_ref, xb_ref, h_hist):
    """Fused-gate LSTM recurrence + Linear(60, 1) head, single invocation.

    x_ref   : (SEQ, 1)     time-major scalar inputs
    whh_ref : (HP, GW)     fused recurrent weights, 64-lane-aligned gate blocks
                           (gate order i,f,g,o; i/f/o columns pre-scaled by 0.5)
    par_ref : (6, GW)      row 0: fused W_ih, 1: fused bias, 2: h0, 3: c0,
                           4: head weight (first 64 lanes), 5: head bias (bcast)
    out_ref : (SEQ, 1)
    xb_ref  : (SEQ, GW)    VMEM scratch: hoisted x*W_ih + b for all steps
    h_hist  : (SEQ, HP)    VMEM scratch: per-step hidden states
    """
    P = HP
    seq = x_ref.shape[0]

    whh = whh_ref[...]                                   # (64, 256), loop-invariant

    # Hoist the input + bias contribution out of the serial recurrence and park
    # it in VMEM: each step then costs one (1, 256) vld on an otherwise-idle
    # load slot instead of a register sublane-select.
    xb_ref[...] = x_ref[...] * par_ref[ROW_WIH:ROW_WIH + 1, :] \
        + par_ref[ROW_B:ROW_B + 1, :]

    h = par_ref[ROW_H0:ROW_H0 + 1, 0:P]                  # (1, 64), pad lanes zero
    c = par_ref[ROW_C0:ROW_C0 + 1, 0:P]                  # (1, 64), pad lanes zero

    # Fully unrolled recurrence: SEQ is a compile-time constant, so every index
    # below is static and h/c stay in vregs across all 8 steps.
    for t in range(seq):
        # One fused (1,64)@(64,256) MXU dot per step covers all four gates.
        z = xb_ref[pl.ds(t, 1), :] + jnp.dot(h, whh,
                                             preferred_element_type=jnp.float32)
        ta = jnp.tanh(z)                                 # one EUP pass, all gates
        # sigmoid(a) = 0.5*tanh(a/2) + 0.5 (i/f/o weight columns pre-halved).
        # Gate blocks are 64-lane aligned: 0 / 64 / 128 / 192.
        i_g = 0.5 * ta[:, 0 * P:1 * P] + 0.5
        f_g = 0.5 * ta[:, 1 * P:2 * P] + 0.5
        g_g = ta[:, 2 * P:3 * P]
        o_g = 0.5 * ta[:, 3 * P:4 * P] + 0.5

        c = f_g * c + i_g * g_g
        h = o_g * jnp.tanh(c)
        h_hist[pl.ds(t, 1), :] = h                       # static-row store

    # Linear(60, 1) head for all timesteps at once: VPU multiply + XLU
    # lane-reduce (an N=1 matvec would waste a full MXU push + drain here).
    low = par_ref[ROW_LOW:ROW_LOW + 1, 0:P]              # (1, 64), pad lanes zero
    lob = par_ref[ROW_LOB:ROW_LOB + 1, 0:1]              # (1, 1)
    out_ref[...] = (jnp.sum(h_hist[...] * low, axis=-1, keepdims=True)
                    + lob).astype(out_ref.dtype)


def prepare_lstm_params(W_ih, W_hh, b_ih, b_hh, lo_w, lo_b, h0, c0):
    """One-time weight prep (call at init, NOT per forward).

    Fuses the four PyTorch gate blocks (order i, f, g, o) into lane-aligned
    64-wide blocks, applies the sigmoid-via-tanh 0.5 pre-scale to the i/f/o
    columns, and packs all small operands into a single (6, GW) slab.
    """
    H, P = HIDDEN, HP
    pad = P - H

    gate_scale = jnp.concatenate([jnp.full((H,), 0.5, jnp.float32),
                                  jnp.full((H,), 0.5, jnp.float32),
                                  jnp.ones((H,), jnp.float32),
                                  jnp.full((H,), 0.5, jnp.float32)])

    def fuse_pad(w):
        # w: (rows, 4H), gate-blocked along the last axis -> (rows, GW) with
        # each gate block zero-padded from H to P lanes.
        w = w * gate_scale[None, :]
        blocks = [jnp.pad(w[:, k * H:(k + 1) * H], ((0, 0), (0, pad)))
                  for k in range(4)]
        return jnp.concatenate(blocks, axis=1)

    whh_t = jnp.concatenate([W_hh[k * H:(k + 1) * H, :].T for k in range(4)],
                            axis=1)                                # (H, 4H)
    wih_t = jnp.concatenate([W_ih[k * H:(k + 1) * H, :].T for k in range(4)],
                            axis=1)                                # (1, 4H)
    b_t = (b_ih + b_hh).reshape(1, 4 * H)                          # (1, 4H)

    whh_fused = jnp.pad(fuse_pad(whh_t), ((0, pad), (0, 0)))       # (64, 256)
    wih_fused = fuse_pad(wih_t)                                    # (1, 256)
    b_fused = fuse_pad(b_t)                                        # (1, 256)

    def row(v):  # (1, n) -> (1, GW), zero-padded on the right
        v = v.reshape(1, -1).astype(jnp.float32)
        return jnp.pad(v, ((0, 0), (0, GW - v.shape[1])))

    params = jnp.concatenate([
        wih_fused,                                                 # ROW_WIH
        b_fused,                                                   # ROW_B
        row(h0),                                                   # ROW_H0
        row(c0),                                                   # ROW_C0
        row(lo_w),                                                 # ROW_LOW
        jnp.broadcast_to(lo_b.reshape(1, 1).astype(jnp.float32),
                         (1, GW)),                                 # ROW_LOB
    ], axis=0)                                                     # (6, 256)
    return whh_fused.astype(jnp.float32), params


def lstm_forward(x, whh_fused, params):
    """Per-call path: just reshape x and invoke the kernel (3 operands)."""
    seq, batch, inp = x.shape
    assert batch == BATCH and inp == INPUT

    x2d = x.reshape(seq, batch * INPUT).astype(jnp.float32)        # (SEQ, 1)

    out2d = pl.pallas_call(
        lstm_kernel,
        out_shape=jax.ShapeDtypeStruct((seq, 1), jnp.float32),
        in_specs=[pl.BlockSpec(memory_space=pltpu.MemorySpace.VMEM)] * 3,
        out_specs=pl.BlockSpec(memory_space=pltpu.MemorySpace.VMEM),
        scratch_shapes=[pltpu.VMEM((seq, GW), jnp.float32),
                        pltpu.VMEM((seq, HP), jnp.float32)],
    )(x2d, whh_fused, params)

    return out2d.reshape(seq, batch, 1)


def lstm_reference(x, W_ih, W_hh, b_ih, b_hh, lo_w, lo_b, h0, c0):
    """Pure-JAX reference mirroring torch.nn.LSTM + Linear per timestep."""
    H = HIDDEN

    def step(carry, x_t):
        h, c = carry
        gates = x_t @ W_ih.T + b_ih + h @ W_hh.T + b_hh     # (batch, 4H)
        i, f, g, o = [gates[:, k * H:(k + 1) * H] for k in range(4)]
        i = jax.nn.sigmoid(i)
        f = jax.nn.sigmoid(f)
        g = jnp.tanh(g)
        o = jax.nn.sigmoid(o)
        c = f * c + i * g
        h = o * jnp.tanh(c)
        y = h @ lo_w.T + lo_b
        return (h, c), y

    _, ys = lax.scan(step, (h0, c0), x)
    return ys


if __name__ == "__main__":
    key = jax.random.PRNGKey(0)
    ks = jax.random.split(key, 9)
    H = HIDDEN
    scale = 1.0 / jnp.sqrt(jnp.float32(H))   # PyTorch uniform(-1/sqrt(H), 1/sqrt(H))

    # LSTM parameters (PyTorch layout): weight_ih_l0 (4H, input), weight_hh_l0 (4H, H)
    W_ih = jax.random.uniform(ks[0], (4 * H, INPUT), jnp.float32, -scale, scale)
    W_hh = jax.random.uniform(ks[1], (4 * H, H), jnp.float32, -scale, scale)
    b_ih = jax.random.uniform(ks[2], (4 * H,), jnp.float32, -scale, scale)
    b_hh = jax.random.uniform(ks[3], (4 * H,), jnp.float32, -scale, scale)
    # Linear(60, 1)
    lo_w = jax.random.uniform(ks[4], (1, H), jnp.float32, -scale, scale)
    lo_b = jax.random.uniform(ks[5], (1,), jnp.float32, -scale, scale)
    # initHidden(): randn(1, 1, 60) each -> (batch, H)
    h0 = jax.random.normal(ks[6], (BATCH, H), jnp.float32)
    c0 = jax.random.normal(ks[7], (BATCH, H), jnp.float32)

    # Input: (seq, batch, input_size)
    x = jax.random.normal(ks[8], (SEQ, BATCH, INPUT), jnp.float32)

    # One-time weight fusion / padding (init-time, not per forward).
    whh_fused, params = prepare_lstm_params(
        W_ih, W_hh, b_ih, b_hh, lo_w, lo_b, h0, c0)
    whh_fused, params = jax.block_until_ready((whh_fused, params))

    out = lstm_forward(x, whh_fused, params)
    out = jax.block_until_ready(out)

    ref = lstm_reference(x, W_ih, W_hh, b_ih, b_hh, lo_w, lo_b, h0, c0)
    assert out.shape == (SEQ, BATCH, 1)
    # Slightly looser atol than float-exact: the sigmoid-via-tanh identity is
    # exact mathematically but takes a different EUP path than jax.nn.sigmoid.
    assert jnp.allclose(out, ref, rtol=1e-4, atol=5e-5), (
        f"max abs err {jnp.max(jnp.abs(out - ref))}")

    print("KERNEL_OK")
</pallas_src>

<mosaic_0001>
module attributes {stable_mosaic.version = 11 : i64} {
  func.func @lstm_kernel(%arg0: memref<8x1xf32, #tpu.memory_space<vmem>>, %arg1: memref<64x256xf32, #tpu.memory_space<vmem>>, %arg2: memref<6x256xf32, #tpu.memory_space<vmem>>, %arg3: memref<8x1xf32, #tpu.memory_space<vmem>>, %arg4: memref<8x256xf32, #tpu.memory_space<vmem>>, %arg5: memref<8x64xf32, #tpu.memory_space<vmem>>) attributes {dimension_semantics = [], scalar_prefetch = 0 : i64, scratch_operands = 2 : i64, tpu.core_type = #tpu.core_type<tc>} {
    %c0 = arith.constant 0 : index
    %c0_0 = arith.constant 0 : index
    %0 = vector.load %arg1[%c0, %c0_0] : memref<64x256xf32, #tpu.memory_space<vmem>>, vector<64x256xf32>
    %c0_1 = arith.constant 0 : index
    %c0_2 = arith.constant 0 : index
    %1 = vector.load %arg0[%c0_1, %c0_2] : memref<8x1xf32, #tpu.memory_space<vmem>>, vector<8x1xf32>
    %c0_3 = arith.constant 0 : index
    %c0_4 = arith.constant 0 : index
    %2 = vector.load %arg2[%c0_3, %c0_4] : memref<6x256xf32, #tpu.memory_space<vmem>>, vector<1x256xf32>
    %3 = vector.broadcast %1 : vector<8x1xf32> to vector<8x256xf32>
    %4 = vector.broadcast %2 : vector<1x256xf32> to vector<8x256xf32>
    %5 = arith.mulf %3, %4 : vector<8x256xf32>
    %c1 = arith.constant 1 : index
    %c0_5 = arith.constant 0 : index
    %6 = vector.load %arg2[%c1, %c0_5] : memref<6x256xf32, #tpu.memory_space<vmem>>, vector<1x256xf32>
    %7 = vector.broadcast %6 : vector<1x256xf32> to vector<8x256xf32>
    %8 = arith.addf %5, %7 : vector<8x256xf32>
    %c0_6 = arith.constant 0 : index
    %c0_7 = arith.constant 0 : index
    %9 = vector.load %arg4[%c0_6, %c0_7] : memref<8x256xf32, #tpu.memory_space<vmem>>, vector<8x256xf32>
    tpu.vector_store %arg4[%c0_6, %c0_7], %8 {strides = array<i32>} : memref<8x256xf32, #tpu.memory_space<vmem>>, vector<8x256xf32>,
    %c2 = arith.constant 2 : index
    %c0_8 = arith.constant 0 : index
    %10 = vector.load %arg2[%c2, %c0_8] : memref<6x256xf32, #tpu.memory_space<vmem>>, vector<1x64xf32>
    %c3 = arith.constant 3 : index
    %c0_9 = arith.constant 0 : index
    %11 = vector.load %arg2[%c3, %c0_9] : memref<6x256xf32, #tpu.memory_space<vmem>>, vector<1x64xf32>
    %c0_10 = arith.constant 0 : index
    %c0_11 = arith.constant 0 : index
    %12 = vector.load %arg4[%c0_10, %c0_11] : memref<8x256xf32, #tpu.memory_space<vmem>>, vector<1x256xf32>
    %cst = arith.constant dense<0.000000e+00> : vector<1x256xf32>
    %13 = tpu.matmul %10, %0, %cst {dimension_numbers = #tpu.dot_dimension_numbers<[1], [0], [0], [1], [0, 0, 1, 1], [], []>} : vector<1x64xf32>, vector<64x256xf32>, vector<1x256xf32> -> vector<1x256xf32>
    %14 = arith.addf %12, %13 : vector<1x256xf32>
    %15 = math.tanh %14 : vector<1x256xf32>
    %16 = vector.extract_strided_slice %15 {offsets = [0, 0], sizes = [1, 64], strides = [1, 1]} : vector<1x256xf32> to vector<1x64xf32>
    %cst_12 = arith.constant 5.000000e-01 : f32
    %17 = vector.broadcast %cst_12 : f32 to vector<1x64xf32>
    %18 = arith.mulf %17, %16 : vector<1x64xf32>
    %cst_13 = arith.constant 5.000000e-01 : f32
    %19 = vector.broadcast %cst_13 : f32 to vector<1x64xf32>
    %20 = arith.addf %18, %19 : vector<1x64xf32>
    %21 = vector.extract_strided_slice %15 {offsets = [0, 64], sizes = [1, 64], strides = [1, 1]} : vector<1x256xf32> to vector<1x64xf32>
    %cst_14 = arith.constant 5.000000e-01 : f32
    %22 = vector.broadcast %cst_14 : f32 to vector<1x64xf32>
    %23 = arith.mulf %22, %21 : vector<1x64xf32>
    %cst_15 = arith.constant 5.000000e-01 : f32
    %24 = vector.broadcast %cst_15 : f32 to vector<1x64xf32>
    %25 = arith.addf %23, %24 : vector<1x64xf32>
    %26 = vector.extract_strided_slice %15 {offsets = [0, 128], sizes = [1, 64], strides = [1, 1]} : vector<1x256xf32> to vector<1x64xf32>
    %27 = vector.extract_strided_slice %15 {offsets = [0, 192], sizes = [1, 64], strides = [1, 1]} : vector<1x256xf32> to vector<1x64xf32>
    %cst_16 = arith.constant 5.000000e-01 : f32
    %28 = vector.broadcast %cst_16 : f32 to vector<1x64xf32>
    %29 = arith.mulf %28, %27 : vector<1x64xf32>
    %cst_17 = arith.constant 5.000000e-01 : f32
    %30 = vector.broadcast %cst_17 : f32 to vector<1x64xf32>
    %31 = arith.addf %29, %30 : vector<1x64xf32>
    %32 = arith.mulf %25, %11 : vector<1x64xf32>
    %33 = arith.mulf %20, %26 : vector<1x64xf32>
    %34 = arith.addf %32, %33 : vector<1x64xf32>
    %35 = math.tanh %34 : vector<1x64xf32>
    %36 = arith.mulf %31, %35 : vector<1x64xf32>
    %c0_18 = arith.constant 0 : index
    %c0_19 = arith.constant 0 : index
    %37 = vector.load %arg5[%c0_18, %c0_19] : memref<8x64xf32, #tpu.memory_space<vmem>>, vector<1x64xf32>
    tpu.vector_store %arg5[%c0_18, %c0_19], %36 {strides = array<i32>} : memref<8x64xf32, #tpu.memory_space<vmem>>, vector<1x64xf32>,
    %c1_20 = arith.constant 1 : index
    %c0_21 = arith.constant 0 : index
    %38 = vector.load %arg4[%c1_20, %c0_21] : memref<8x256xf32, #tpu.memory_space<vmem>>, vector<1x256xf32>
    %cst_22 = arith.constant dense<0.000000e+00> : vector<1x256xf32>
    %39 = tpu.matmul %36, %0, %cst_22 {dimension_numbers = #tpu.dot_dimension_numbers<[1], [0], [0], [1], [0, 0, 1, 1], [], []>} : vector<1x64xf32>, vector<64x256xf32>, vector<1x256xf32> -> vector<1x256xf32>
    %40 = arith.addf %38, %39 : vector<1x256xf32>
    %41 = math.tanh %40 : vector<1x256xf32>
    %42 = vector.extract_strided_slice %41 {offsets = [0, 0], sizes = [1, 64], strides = [1, 1]} : vector<1x256xf32> to vector<1x64xf32>
    %cst_23 = arith.constant 5.000000e-01 : f32
    %43 = vector.broadcast %cst_23 : f32 to vector<1x64xf32>
    %44 = arith.mulf %43, %42 : vector<1x64xf32>
    %cst_24 = arith.constant 5.000000e-01 : f32
    %45 = vector.broadcast %cst_24 : f32 to vector<1x64xf32>
    %46 = arith.addf %44, %45 : vector<1x64xf32>
    %47 = vector.extract_strided_slice %41 {offsets = [0, 64], sizes = [1, 64], strides = [1, 1]} : vector<1x256xf32> to vector<1x64xf32>
    %cst_25 = arith.constant 5.000000e-01 : f32
    %48 = vector.broadcast %cst_25 : f32 to vector<1x64xf32>
    %49 = arith.mulf %48, %47 : vector<1x64xf32>
    %cst_26 = arith.constant 5.000000e-01 : f32
    %50 = vector.broadcast %cst_26 : f32 to vector<1x64xf32>
    %51 = arith.addf %49, %50 : vector<1x64xf32>
    %52 = vector.extract_strided_slice %41 {offsets = [0, 128], sizes = [1, 64], strides = [1, 1]} : vector<1x256xf32> to vector<1x64xf32>
    %53 = vector.extract_strided_slice %41 {offsets = [0, 192], sizes = [1, 64], strides = [1, 1]} : vector<1x256xf32> to vector<1x64xf32>
    %cst_27 = arith.constant 5.000000e-01 : f32
    %54 = vector.broadcast %cst_27 : f32 to vector<1x64xf32>
    %55 = arith.mulf %54, %53 : vector<1x64xf32>
    %cst_28 = arith.constant 5.000000e-01 : f32
    %56 = vector.broadcast %cst_28 : f32 to vector<1x64xf32>
    %57 = arith.addf %55, %56 : vector<1x64xf32>
    %58 = arith.mulf %51, %34 : vector<1x64xf32>
    %59 = arith.mulf %46, %52 : vector<1x64xf32>
    %60 = arith.addf %58, %59 : vector<1x64xf32>
    %61 = math.tanh %60 : vector<1x64xf32>
    %62 = arith.mulf %57, %61 : vector<1x64xf32>
    %c1_29 = arith.constant 1 : index
    %c0_30 = arith.constant 0 : index
    %63 = vector.load %arg5[%c1_29, %c0_30] : memref<8x64xf32, #tpu.memory_space<vmem>>, vector<1x64xf32>
    tpu.vector_store %arg5[%c1_29, %c0_30], %62 {strides = array<i32>} : memref<8x64xf32, #tpu.memory_space<vmem>>, vector<1x64xf32>,
    %c2_31 = arith.constant 2 : index
    %c0_32 = arith.constant 0 : index
    %64 = vector.load %arg4[%c2_31, %c0_32] : memref<8x256xf32, #tpu.memory_space<vmem>>, vector<1x256xf32>
    %cst_33 = arith.constant dense<0.000000e+00> : vector<1x256xf32>
    %65 = tpu.matmul %62, %0, %cst_33 {dimension_numbers = #tpu.dot_dimension_numbers<[1], [0], [0], [1], [0, 0, 1, 1], [], []>} : vector<1x64xf32>, vector<64x256xf32>, vector<1x256xf32> -> vector<1x256xf32>
    %66 = arith.addf %64, %65 : vector<1x256xf32>
    %67 = math.tanh %66 : vector<1x256xf32>
    %68 = vector.extract_strided_slice %67 {offsets = [0, 0], sizes = [1, 64], strides = [1, 1]} : vector<1x256xf32> to vector<1x64xf32>
    %cst_34 = arith.constant 5.000000e-01 : f32
    %69 = vector.broadcast %cst_34 : f32 to vector<1x64xf32>
    %70 = arith.mulf %69, %68 : vector<1x64xf32>
    %cst_35 = arith.constant 5.000000e-01 : f32
    %71 = vector.broadcast %cst_35 : f32 to vector<1x64xf32>
    %72 = arith.addf %70, %71 : vector<1x64xf32>
    %73 = vector.extract_strided_slice %67 {offsets = [0, 64], sizes = [1, 64], strides = [1, 1]} : vector<1x256xf32> to vector<1x64xf32>
    %cst_36 = arith.constant 5.000000e-01 : f32
    %74 = vector.broadcast %cst_36 : f32 to vector<1x64xf32>
    %75 = arith.mulf %74, %73 : vector<1x64xf32>
    %cst_37 = arith.constant 5.000000e-01 : f32
    %76 = vector.broadcast %cst_37 : f32 to vector<1x64xf32>
    %77 = arith.addf %75, %76 : vector<1x64xf32>
    %78 = vector.extract_strided_slice %67 {offsets = [0, 128], sizes = [1, 64], strides = [1, 1]} : vector<1x256xf32> to vector<1x64xf32>
    %79 = vector.extract_strided_slice %67 {offsets = [0, 192], sizes = [1, 64], strides = [1, 1]} : vector<1x256xf32> to vector<1x64xf32>
    %cst_38 = arith.constant 5.000000e-01 : f32
    %80 = vector.broadcast %cst_38 : f32 to vector<1x64xf32>
    %81 = arith.mulf %80, %79 : vector<1x64xf32>
    %cst_39 = arith.constant 5.000000e-01 : f32
    %82 = vector.broadcast %cst_39 : f32 to vector<1x64xf32>
    %83 = arith.addf %81, %82 : vector<1x64xf32>
    %84 = arith.mulf %77, %60 : vector<1x64xf32>
    %85 = arith.mulf %72, %78 : vector<1x64xf32>
    %86 = arith.addf %84, %85 : vector<1x64xf32>
    %87 = math.tanh %86 : vector<1x64xf32>
    %88 = arith.mulf %83, %87 : vector<1x64xf32>
    %c2_40 = arith.constant 2 : index
    %c0_41 = arith.constant 0 : index
    %89 = vector.load %arg5[%c2_40, %c0_41] : memref<8x64xf32, #tpu.memory_space<vmem>>, vector<1x64xf32>
    tpu.vector_store %arg5[%c2_40, %c0_41], %88 {strides = array<i32>} : memref<8x64xf32, #tpu.memory_space<vmem>>, vector<1x64xf32>,
    %c3_42 = arith.constant 3 : index
    %c0_43 = arith.constant 0 : index
    %90 = vector.load %arg4[%c3_42, %c0_43] : memref<8x256xf32, #tpu.memory_space<vmem>>, vector<1x256xf32>
    %cst_44 = arith.constant dense<0.000000e+00> : vector<1x256xf32>
    %91 = tpu.matmul %88, %0, %cst_44 {dimension_numbers = #tpu.dot_dimension_numbers<[1], [0], [0], [1], [0, 0, 1, 1], [], []>} : vector<1x64xf32>, vector<64x256xf32>, vector<1x256xf32> -> vector<1x256xf32>
    %92 = arith.addf %90, %91 : vector<1x256xf32>
    %93 = math.tanh %92 : vector<1x256xf32>
    %94 = vector.extract_strided_slice %93 {offsets = [0, 0], sizes = [1, 64], strides = [1, 1]} : vector<1x256xf32> to vector<1x64xf32>
    %cst_45 = arith.constant 5.000000e-01 : f32
    %95 = vector.broadcast %cst_45 : f32 to vector<1x64xf32>
    %96 = arith.mulf %95, %94 : vector<1x64xf32>
    %cst_46 = arith.constant 5.000000e-01 : f32
    %97 = vector.broadcast %cst_46 : f32 to vector<1x64xf32>
    %98 = arith.addf %96, %97 : vector<1x64xf32>
    %99 = vector.extract_strided_slice %93 {offsets = [0, 64], sizes = [1, 64], strides = [1, 1]} : vector<1x256xf32> to vector<1x64xf32>
    %cst_47 = arith.constant 5.000000e-01 : f32
    %100 = vector.broadcast %cst_47 : f32 to vector<1x64xf32>
    %101 = arith.mulf %100, %99 : vector<1x64xf32>
    %cst_48 = arith.constant 5.000000e-01 : f32
    %102 = vector.broadcast %cst_48 : f32 to vector<1x64xf32>
    %103 = arith.addf %101, %102 : vector<1x64xf32>
    %104 = vector.extract_strided_slice %93 {offsets = [0, 128], sizes = [1, 64], strides = [1, 1]} : vector<1x256xf32> to vector<1x64xf32>
    %105 = vector.extract_strided_slice %93 {offsets = [0, 192], sizes = [1, 64], strides = [1, 1]} : vector<1x256xf32> to vector<1x64xf32>
    %cst_49 = arith.constant 5.000000e-01 : f32
    %106 = vector.broadcast %cst_49 : f32 to vector<1x64xf32>
    %107 = arith.mulf %106, %105 : vector<1x64xf32>
    %cst_50 = arith.constant 5.000000e-01 : f32
    %108 = vector.broadcast %cst_50 : f32 to vector<1x64xf32>
    %109 = arith.addf %107, %108 : vector<1x64xf32>
    %110 = arith.mulf %103, %86 : vector<1x64xf32>
    %111 = arith.mulf %98, %104 : vector<1x64xf32>
    %112 = arith.addf %110, %111 : vector<1x64xf32>
    %113 = math.tanh %112 : vector<1x64xf32>
    %114 = arith.mulf %109, %113 : vector<1x64xf32>
    %c3_51 = arith.constant 3 : index
    %c0_52 = arith.constant 0 : index
    %115 = vector.load %arg5[%c3_51, %c0_52] : memref<8x64xf32, #tpu.memory_space<vmem>>, vector<1x64xf32>
    tpu.vector_store %arg5[%c3_51, %c0_52], %114 {strides = array<i32>} : memref<8x64xf32, #tpu.memory_space<vmem>>, vector<1x64xf32>,
    %c4 = arith.constant 4 : index
    %c0_53 = arith.constant 0 : index
    %116 = vector.load %arg4[%c4, %c0_53] : memref<8x256xf32, #tpu.memory_space<vmem>>, vector<1x256xf32>
    %cst_54 = arith.constant dense<0.000000e+00> : vector<1x256xf32>
    %117 = tpu.matmul %114, %0, %cst_54 {dimension_numbers = #tpu.dot_dimension_numbers<[1], [0], [0], [1], [0, 0, 1, 1], [], []>} : vector<1x64xf32>, vector<64x256xf32>, vector<1x256xf32> -> vector<1x256xf32>
    %118 = arith.addf %116, %117 : vector<1x256xf32>
    %119 = math.tanh %118 : vector<1x256xf32>
    %120 = vector.extract_strided_slice %119 {offsets = [0, 0], sizes = [1, 64], strides = [1, 1]} : vector<1x256xf32> to vector<1x64xf32>
    %cst_55 = arith.constant 5.000000e-01 : f32
    %121 = vector.broadcast %cst_55 : f32 to vector<1x64xf32>
    %122 = arith.mulf %121, %120 : vector<1x64xf32>
    %cst_56 = arith.constant 5.000000e-01 : f32
    %123 = vector.broadcast %cst_56 : f32 to vector<1x64xf32>
    %124 = arith.addf %122, %123 : vector<1x64xf32>
    %125 = vector.extract_strided_slice %119 {offsets = [0, 64], sizes = [1, 64], strides = [1, 1]} : vector<1x256xf32> to vector<1x64xf32>
    %cst_57 = arith.constant 5.000000e-01 : f32
    %126 = vector.broadcast %cst_57 : f32 to vector<1x64xf32>
    %127 = arith.mulf %126, %125 : vector<1x64xf32>
    %cst_58 = arith.constant 5.000000e-01 : f32
    %128 = vector.broadcast %cst_58 : f32 to vector<1x64xf32>
    %129 = arith.addf %127, %128 : vector<1x64xf32>
    %130 = vector.extract_strided_slice %119 {offsets = [0, 128], sizes = [1, 64], strides = [1, 1]} : vector<1x256xf32> to vector<1x64xf32>
    %131 = vector.extract_strided_slice %119 {offsets = [0, 192], sizes = [1, 64], strides = [1, 1]} : vector<1x256xf32> to vector<1x64xf32>
    %cst_59 = arith.constant 5.000000e-01 : f32
    %132 = vector.broadcast %cst_59 : f32 to vector<1x64xf32>
    %133 = arith.mulf %132, %131 : vector<1x64xf32>
    %cst_60 = arith.constant 5.000000e-01 : f32
    %134 = vector.broadcast %cst_60 : f32 to vector<1x64xf32>
    %135 = arith.addf %133, %134 : vector<1x64xf32>
    %136 = arith.mulf %129, %112 : vector<1x64xf32>
    %137 = arith.mulf %124, %130 : vector<1x64xf32>
    %138 = arith.addf %136, %137 : vector<1x64xf32>
    %139 = math.tanh %138 : vector<1x64xf32>
    %140 = arith.mulf %135, %139 : vector<1x64xf32>
    %c4_61 = arith.constant 4 : index
    %c0_62 = arith.constant 0 : index
    %141 = vector.load %arg5[%c4_61, %c0_62] : memref<8x64xf32, #tpu.memory_space<vmem>>, vector<1x64xf32>
    tpu.vector_store %arg5[%c4_61, %c0_62], %140 {strides = array<i32>} : memref<8x64xf32, #tpu.memory_space<vmem>>, vector<1x64xf32>,
    %c5 = arith.constant 5 : index
    %c0_63 = arith.constant 0 : index
    %142 = vector.load %arg4[%c5, %c0_63] : memref<8x256xf32, #tpu.memory_space<vmem>>, vector<1x256xf32>
    %cst_64 = arith.constant dense<0.000000e+00> : vector<1x256xf32>
    %143 = tpu.matmul %140, %0, %cst_64 {dimension_numbers = #tpu.dot_dimension_numbers<[1], [0], [0], [1], [0, 0, 1, 1], [], []>} : vector<1x64xf32>, vector<64x256xf32>, vector<1x256xf32> -> vector<1x256xf32>
    %144 = arith.addf %142, %143 : vector<1x256xf32>
    %145 = math.tanh %144 : vector<1x256xf32>
    %146 = vector.extract_strided_slice %145 {offsets = [0, 0], sizes = [1, 64], strides = [1, 1]} : vector<1x256xf32> to vector<1x64xf32>
    %cst_65 = arith.constant 5.000000e-01 : f32
    %147 = vector.broadcast %cst_65 : f32 to vector<1x64xf32>
    %148 = arith.mulf %147, %146 : vector<1x64xf32>
    %cst_66 = arith.constant 5.000000e-01 : f32
    %149 = vector.broadcast %cst_66 : f32 to vector<1x64xf32>
    %150 = arith.addf %148, %149 : vector<1x64xf32>
    %151 = vector.extract_strided_slice %145 {offsets = [0, 64], sizes = [1, 64], strides = [1, 1]} : vector<1x256xf32> to vector<1x64xf32>
    %cst_67 = arith.constant 5.000000e-01 : f32
    %152 = vector.broadcast %cst_67 : f32 to vector<1x64xf32>
    %153 = arith.mulf %152, %151 : vector<1x64xf32>
    %cst_68 = arith.constant 5.000000e-01 : f32
    %154 = vector.broadcast %cst_68 : f32 to vector<1x64xf32>
    %155 = arith.addf %153, %154 : vector<1x64xf32>
    %156 = vector.extract_strided_slice %145 {offsets = [0, 128], sizes = [1, 64], strides = [1, 1]} : vector<1x256xf32> to vector<1x64xf32>
    %157 = vector.extract_strided_slice %145 {offsets = [0, 192], sizes = [1, 64], strides = [1, 1]} : vector<1x256xf32> to vector<1x64xf32>
    %cst_69 = arith.constant 5.000000e-01 : f32
    %158 = vector.broadcast %cst_69 : f32 to vector<1x64xf32>
    %159 = arith.mulf %158, %157 : vector<1x64xf32>
    %cst_70 = arith.constant 5.000000e-01 : f32
    %160 = vector.broadcast %cst_70 : f32 to vector<1x64xf32>
    %161 = arith.addf %159, %160 : vector<1x64xf32>
    %162 = arith.mulf %155, %138 : vector<1x64xf32>
    %163 = arith.mulf %150, %156 : vector<1x64xf32>
    %164 = arith.addf %162, %163 : vector<1x64xf32>
    %165 = math.tanh %164 : vector<1x64xf32>
    %166 = arith.mulf %161, %165 : vector<1x64xf32>
    %c5_71 = arith.constant 5 : index
    %c0_72 = arith.constant 0 : index
    %167 = vector.load %arg5[%c5_71, %c0_72] : memref<8x64xf32, #tpu.memory_space<vmem>>, vector<1x64xf32>
    tpu.vector_store %arg5[%c5_71, %c0_72], %166 {strides = array<i32>} : memref<8x64xf32, #tpu.memory_space<vmem>>, vector<1x64xf32>,
    %c6 = arith.constant 6 : index
    %c0_73 = arith.constant 0 : index
    %168 = vector.load %arg4[%c6, %c0_73] : memref<8x256xf32, #tpu.memory_space<vmem>>, vector<1x256xf32>
    %cst_74 = arith.constant dense<0.000000e+00> : vector<1x256xf32>
    %169 = tpu.matmul %166, %0, %cst_74 {dimension_numbers = #tpu.dot_dimension_numbers<[1], [0], [0], [1], [0, 0, 1, 1], [], []>} : vector<1x64xf32>, vector<64x256xf32>, vector<1x256xf32> -> vector<1x256xf32>
    %170 = arith.addf %168, %169 : vector<1x256xf32>
    %171 = math.tanh %170 : vector<1x256xf32>
    %172 = vector.extract_strided_slice %171 {offsets = [0, 0], sizes = [1, 64], strides = [1, 1]} : vector<1x256xf32> to vector<1x64xf32>
    %cst_75 = arith.constant 5.000000e-01 : f32
    %173 = vector.broadcast %cst_75 : f32 to vector<1x64xf32>
    %174 = arith.mulf %173, %172 : vector<1x64xf32>
    %cst_76 = arith.constant 5.000000e-01 : f32
    %175 = vector.broadcast %cst_76 : f32 to vector<1x64xf32>
    %176 = arith.addf %174, %175 : vector<1x64xf32>
    %177 = vector.extract_strided_slice %171 {offsets = [0, 64], sizes = [1, 64], strides = [1, 1]} : vector<1x256xf32> to vector<1x64xf32>
    %cst_77 = arith.constant 5.000000e-01 : f32
    %178 = vector.broadcast %cst_77 : f32 to vector<1x64xf32>
    %179 = arith.mulf %178, %177 : vector<1x64xf32>
    %cst_78 = arith.constant 5.000000e-01 : f32
    %180 = vector.broadcast %cst_78 : f32 to vector<1x64xf32>
    %181 = arith.addf %179, %180 : vector<1x64xf32>
    %182 = vector.extract_strided_slice %171 {offsets = [0, 128], sizes = [1, 64], strides = [1, 1]} : vector<1x256xf32> to vector<1x64xf32>
    %183 = vector.extract_strided_slice %171 {offsets = [0, 192], sizes = [1, 64], strides = [1, 1]} : vector<1x256xf32> to vector<1x64xf32>
    %cst_79 = arith.constant 5.000000e-01 : f32
    %184 = vector.broadcast %cst_79 : f32 to vector<1x64xf32>
    %185 = arith.mulf %184, %183 : vector<1x64xf32>
    %cst_80 = arith.constant 5.000000e-01 : f32
    %186 = vector.broadcast %cst_80 : f32 to vector<1x64xf32>
    %187 = arith.addf %185, %186 : vector<1x64xf32>
    %188 = arith.mulf %181, %164 : vector<1x64xf32>
    %189 = arith.mulf %176, %182 : vector<1x64xf32>
    %190 = arith.addf %188, %189 : vector<1x64xf32>
    %191 = math.tanh %190 : vector<1x64xf32>
    %192 = arith.mulf %187, %191 : vector<1x64xf32>
    %c6_81 = arith.constant 6 : index
    %c0_82 = arith.constant 0 : index
    %193 = vector.load %arg5[%c6_81, %c0_82] : memref<8x64xf32, #tpu.memory_space<vmem>>, vector<1x64xf32>
    tpu.vector_store %arg5[%c6_81, %c0_82], %192 {strides = array<i32>} : memref<8x64xf32, #tpu.memory_space<vmem>>, vector<1x64xf32>,
    %c7 = arith.constant 7 : index
    %c0_83 = arith.constant 0 : index
    %194 = vector.load %arg4[%c7, %c0_83] : memref<8x256xf32, #tpu.memory_space<vmem>>, vector<1x256xf32>
    %cst_84 = arith.constant dense<0.000000e+00> : vector<1x256xf32>
    %195 = tpu.matmul %192, %0, %cst_84 {dimension_numbers = #tpu.dot_dimension_numbers<[1], [0], [0], [1], [0, 0, 1, 1], [], []>} : vector<1x64xf32>, vector<64x256xf32>, vector<1x256xf32> -> vector<1x256xf32>
    %196 = arith.addf %194, %195 : vector<1x256xf32>
    %197 = math.tanh %196 : vector<1x256xf32>
    %198 = vector.extract_strided_slice %197 {offsets = [0, 0], sizes = [1, 64], strides = [1, 1]} : vector<1x256xf32> to vector<1x64xf32>
    %cst_85 = arith.constant 5.000000e-01 : f32
    %199 = vector.broadcast %cst_85 : f32 to vector<1x64xf32>
    %200 = arith.mulf %199, %198 : vector<1x64xf32>
    %cst_86 = arith.constant 5.000000e-01 : f32
    %201 = vector.broadcast %cst_86 : f32 to vector<1x64xf32>
    %202 = arith.addf %200, %201 : vector<1x64xf32>
    %203 = vector.extract_strided_slice %197 {offsets = [0, 64], sizes = [1, 64], strides = [1, 1]} : vector<1x256xf32> to vector<1x64xf32>
    %cst_87 = arith.constant 5.000000e-01 : f32
    %204 = vector.broadcast %cst_87 : f32 to vector<1x64xf32>
    %205 = arith.mulf %204, %203 : vector<1x64xf32>
    %cst_88 = arith.constant 5.000000e-01 : f32
    %206 = vector.broadcast %cst_88 : f32 to vector<1x64xf32>
    %207 = arith.addf %205, %206 : vector<1x64xf32>
    %208 = vector.extract_strided_slice %197 {offsets = [0, 128], sizes = [1, 64], strides = [1, 1]} : vector<1x256xf32> to vector<1x64xf32>
    %209 = vector.extract_strided_slice %197 {offsets = [0, 192], sizes = [1, 64], strides = [1, 1]} : vector<1x256xf32> to vector<1x64xf32>
    %cst_89 = arith.constant 5.000000e-01 : f32
    %210 = vector.broadcast %cst_89 : f32 to vector<1x64xf32>
    %211 = arith.mulf %210, %209 : vector<1x64xf32>
    %cst_90 = arith.constant 5.000000e-01 : f32
    %212 = vector.broadcast %cst_90 : f32 to vector<1x64xf32>
    %213 = arith.addf %211, %212 : vector<1x64xf32>
    %214 = arith.mulf %207, %190 : vector<1x64xf32>
    %215 = arith.mulf %202, %208 : vector<1x64xf32>
    %216 = arith.addf %214, %215 : vector<1x64xf32>
    %217 = math.tanh %216 : vector<1x64xf32>
    %218 = arith.mulf %213, %217 : vector<1x64xf32>
    %c7_91 = arith.constant 7 : index
    %c0_92 = arith.constant 0 : index
    %219 = vector.load %arg5[%c7_91, %c0_92] : memref<8x64xf32, #tpu.memory_space<vmem>>, vector<1x64xf32>
    tpu.vector_store %arg5[%c7_91, %c0_92], %218 {strides = array<i32>} : memref<8x64xf32, #tpu.memory_space<vmem>>, vector<1x64xf32>,
    %c4_93 = arith.constant 4 : index
    %c0_94 = arith.constant 0 : index
    %220 = vector.load %arg2[%c4_93, %c0_94] : memref<6x256xf32, #tpu.memory_space<vmem>>, vector<1x64xf32>
    %c5_95 = arith.constant 5 : index
    %c0_96 = arith.constant 0 : index
    %221 = vector.load %arg2[%c5_95, %c0_96] : memref<6x256xf32, #tpu.memory_space<vmem>>, vector<1x1xf32>
    %c0_97 = arith.constant 0 : index
    %c0_98 = arith.constant 0 : index
    %222 = vector.load %arg5[%c0_97, %c0_98] : memref<8x64xf32, #tpu.memory_space<vmem>>, vector<8x64xf32>
    %223 = vector.broadcast %220 : vector<1x64xf32> to vector<8x64xf32>
    %224 = arith.mulf %222, %223 : vector<8x64xf32>
    %cst_99 = arith.constant dense<0.000000e+00> : vector<8xf32>
    %225 = vector.multi_reduction <add>, %224, %cst_99 [1] : vector<8x64xf32> to vector<8xf32>
    %226 = vector.shape_cast %225 : vector<8xf32> to vector<8x1xf32>
    %227 = vector.broadcast %221 : vector<1x1xf32> to vector<8x1xf32>
    %228 = arith.addf %226, %227 : vector<8x1xf32>
    %c0_100 = arith.constant 0 : index
    %c0_101 = arith.constant 0 : index
    %229 = vector.load %arg3[%c0_100, %c0_101] : memref<8x1xf32, #tpu.memory_space<vmem>>, vector<8x1xf32>
    tpu.vector_store %arg3[%c0_100, %c0_101], %228 {strides = array<i32>} : memref<8x1xf32, #tpu.memory_space<vmem>>, vector<8x1xf32>,
    return
  }
}

</mosaic_0001>

<bundles_post_ra>
// kernel: tpu_custom_call.1
= control target key start
LH: loop header
LB: loop body
LE: loop exit
PB: predicated region body
PF: predicated region fallthrough
CT: control target
= control target key end

     0   :  { %8 = vsyncpa [#allocation5], 0  ;;  %s1286_s12 = smov [#allocation4]   ;;  %s1504_s0 = inlined_call_operand.vmem [shape: f32[8,1], index: 0, kind: input, shape index: {}]   ;;  %s1505_s1 = inlined_call_operand.hbm [shape: f32[64,256], index: 1, kind: input, shape index: {}]   ;;  %s1506_s2 = inlined_call_operand.vmem [shape: f32[6,256], index: 2, kind: input, shape index: {}]   ;;  %s1507_s3 = inlined_call_operand.vmem [shape: f32[8,1], index: 3, kind: output, shape index: {}]  }
   0x1   :  { %s16_s13 = sshll.u32 %s1286_s12, 4  ;;  %s1262_s16 = scalar_lea.hbm %s1505_s1, 2048  ;;  %s17_s13 = int_to_ptr.vmem [resolvable:$true] %s16_s13 }
   0x2   :  { %p1263_p0 = scmp.ne.s32.totalorder %s1505_s1, %s1262_s16  ;;  %p1266_p1 = scmp.lt.u32.totalorder %s1262_s16, %s1505_s1 }
   0x4   :  { %p1268_p2 = pnand %p1266_p1, %p1263_p0 }
   0x6   :  { %1271 = shalt.err (!%p1268_p2)
}
   0x7   :  { %s1272_s21 = scalar_lea.vmem %s17_s13, 2048  ;;  %p1277_p4 = scmp.lt.s32.totalorder %s17_s13, %s17_s13 }
   0x8   :  { %p1273_p3 = scmp.ne.s32.totalorder %s17_s13, %s1272_s21  ;;  %p1278_p5 = scmp.lt.s32.totalorder %s1272_s21, %s1272_s21 }
   0xa   :  { %p1279_p6 = por %p1278_p5, %p1277_p4 }
   0xc   :  { %p1280_p7 = pnand %p1279_p6, %p1273_p3 }
   0xe   :  { %1283 = shalt.err (!%p1280_p7)
}
   0xf   :  { %s1287_s22 = smov 256   ;;  %s1288_s23 = smov 16  }
  0x10   :  { %22 = dma.hbm_to_vmem [thread:$0]  %s1505_s1, 2048, %s17_s13, [#allocation5], %s1287_s22, %s1287_s22, %s1288_s23  }
  0x11   :  { %1284 = dma.done.wait [#allocation5], 2048  }
  0x12   :  { %1285 = vsyncadd [#allocation5], 4294965248  ;;  %v1289_v0 = vmov 0.0   ;;  %v1290_v1 = vmov 0   ;;  %v52_v2 = vlaneseq  ;;  %v1291_v3 = vmov 1966171168  }
  0x13   :  { %152 = vmatprep.mubr.f32.mxu0 %v1289_v0  ;;  %1229 = vset.pattern.permute.xlu0 %v1290_v1  ;;  %v163_v4 = vunpack.c.l.s4 %v1291_v3  ;;  %v29_v7 = vld [vmem:[#allocation4 + $0x8] sm:$0xff]  ;;  %v31_v8 = vld [vmem:[#allocation4 + $0x18] sm:$0xff]  ;;  %v28_v9 = vld [vmem:[#allocation4] sm:$0xff]  ;;  %vm84_vm0 = vcmask 523264   ;;  %vm221_vm1 = vcmask 516096   ;;  %vm1078_vm2 = vcmask 7168  }
  0x14   :  { %292 = vmatprep.mubr.f32.mxu1 %v1289_v0  ;;  %v1327_v5 = vshrl.u32 %v52_v2, 7  ;;  %v1329_v10 = vpack.c.bf16 %v31_v8, %v29_v7  ;;  %v30_v11 = vld [vmem:[#allocation4 + $0x10] sm:$0xff]  ;;  %v33_v12 = vld [vmem:[#allocation4 + $0x28] sm:$0xff]  ;;  %v35_v13 = vld [vmem:[#allocation4 + $0x38] sm:$0xff] }
  0x15   :  { %v164_v6 = vunpack.c.0.s8 %v163_v4  ;;  %v1331_v14 = vpack.c.bf16 %v30_v11, %v28_v9  ;;  %v1333_v15 = vpack.c.bf16 %v35_v13, %v33_v12  ;;  %v32_v16 = vld [vmem:[#allocation4 + $0x20] sm:$0xff]  ;;  %v34_v17 = vld [vmem:[#allocation4 + $0x30] sm:$0xff]  ;;  %v37_v18 = vld [vmem:[#allocation4 + $0x48] sm:$0xff] }
  0x16   :  { %1095 = vmatprep.subr.bf16.mxu0 %v1329_v10  ;;  %v39_v19 = vld [vmem:[#allocation4 + $0x58] sm:$0xff]  ;;  %1111 = vmatprep.subr.bf16.mxu1 %v1329_v10  ;;  %v1341_v21 = vpack.c.bf16 %v34_v17, %v32_v16  ;;  %v36_v23 = vld [vmem:[#allocation4 + $0x40] sm:$0xff]  ;;  %v38_v24 = vld [vmem:[#allocation4 + $0x50] sm:$0xff]  ;;  %v54_v37 = vsub.s32 0, %v1327_v5  ;;  %v58_v38 = vsub.s32 1, %v1327_v5 }
  0x17   :  { %v1337_v20 = vsub.s32 %v164_v6, %v1327_v5  ;;  %1097 = vmatpush1.bf16.msra.mxu0 %v1331_v14  ;;  %1113 = vmatpush1.bf16.msra.mxu1 %v1331_v14  ;;  %v1345_v22 = vpack.c.bf16 %v39_v19, %v37_v18  ;;  %v44_v25 = vld [vmem:[%s1504_s0] sm:$0xff]  ;;  %v41_v26 = vld [vmem:[#allocation4 + $0x68] sm:$0xff]  ;;  %v1356_v30 = vpack.c.bf16 %v38_v24, %v36_v23  ;;  %v40_v32 = vld [vmem:[#allocation4 + $0x60] sm:$0xff]  ;;  %s1292_s0 = smov 64  }
  0x18   :  { %1099 = vmatprep.subr.bf16.mxu0 %v1333_v15  ;;  %1115 = vmatprep.subr.bf16.mxu1 %v1333_v15  ;;  %v43_v27 = vld [vmem:[#allocation4 + $0x78] sm:$0xff]  ;;  %v42_v33 = vld [vmem:[#allocation4 + $0x70] sm:$0xff] }
  0x19   :  { %48 = vperm.xlu0 %1229, %v44_v25   ;;  %v82_v28 = vld [vmem:[%s1506_s2 + $0x3] ss:$0 sm:$0xff]  ;;  %v1360_v31 = vpack.c.bf16 %v43_v27, %v41_v26  ;;  %v1366_v35 = vpack.c.bf16 %v42_v33, %v40_v32  ;;  %v81_v36 = vld [vmem:[%s1506_s2 + $0x2] ss:$0 sm:$0xff] }
  0x1a   :  { %v195_v29 = vrot.slane %v82_v28, %v1337_v20  ;;  %v45_v39 = vld [vmem:[%s1506_s2] ss:$8 sm:$0x3]  ;;  %v1085_v40 = vld [vmem:[%s1506_s2 + $0x1] ss:$8 sm:$0x3] }
  0x1b   :  { %1101 = vmatpush1.bf16.msra.mxu0 %v1341_v21  ;;  %1117 = vmatpush1.bf16.msra.mxu1 %v1341_v21  ;;  %v55_v41 = vrot.slane %v45_v39, %v54_v37  ;;  %v59_v42 = vrot.slane %v45_v39, %v58_v38  ;;  %v70_v43 = vrot.slane %v1085_v40, %v54_v37 }
  0x1c   :  { %1103 = vmatprep.subr.bf16.mxu0 %v1345_v22  ;;  %v202_v34 = vrot.slane %v195_v29, %v1337_v20  ;;  %1119 = vmatprep.subr.bf16.mxu1 %v1345_v22  ;;  %v74_v44 = vrot.slane %v1085_v40, %v58_v38 }
  0x1e   :  { %203 = vrot.lane.b32.xlu0 %v202_v34, %s1292_s0 }
  0x1f   :  { %1105 = vmatpush1.bf16.msra.mxu0 %v1356_v30  ;;  %1121 = vmatpush1.bf16.msra.mxu1 %v1356_v30 }
  0x20   :  { %1107 = vmatprep.subr.bf16.mxu0 %v1360_v31  ;;  %1123 = vmatprep.subr.bf16.mxu1 %v1360_v31 }
  0x23   :  { %1109 = vmatpush1.bf16.msra.mxu0 %v1366_v35  ;;  %1125 = vmatpush1.bf16.msra.mxu1 %v1366_v35 }
  0x24   :  { %1127 = vmatprep.subr.bf16.mxu0 %v1329_v10  ;;  %1143 = vmatprep.subr.bf16.mxu1 %v1329_v10 }
  0x26   :  { %1086 = vmatmul.mubr.msk.f32.vlgmr.msra.gmra.mrb[0].mxu0 %vm84_vm0, %v81_v36 }
  0x27   :  { %1129 = vmatpush1.bf16.msra.mxu0 %v1331_v14  ;;  %413 = vmatprep.mubr.f32.mxu0 %v1289_v0 }
  0x28   :  { %1131 = vmatprep.subr.bf16.mxu0 %v1333_v15 }
  0x2b   :  { %1133 = vmatpush1.bf16.msra.mxu0 %v1341_v21 }
  0x2c   :  { %1135 = vmatprep.subr.bf16.mxu0 %v1345_v22 }
  0x2f   :  { %1137 = vmatpush1.bf16.msra.mxu0 %v1356_v30 }
  0x30   :  { %1139 = vmatprep.subr.bf16.mxu0 %v1360_v31 }
  0x33   :  { %1141 = vmatpush1.bf16.msra.mxu0 %v1366_v35 }
  0x34   :  { %1159 = vmatprep.subr.bf16.mxu0 %v1329_v10 }
  0x98   :  { %v49_v45 = vpop.permute.xlu0 %48 }
  0x99   :  { %v62_v46 = vmul.f32 %v55_v41, %v49_v45  ;;  %v63_v47 = vmul.f32 %v59_v42, %v49_v45 }
  0x9b   :  { %v77_v48 = vadd.f32 %v70_v43, %v62_v46  ;;  %v78_v49 = vadd.f32 %v74_v44, %v63_v47 }
  0x9c   :  { %v204_v62 = vpop.permute.xlu0 %203 }
  0x9d   :  { %79 = vst [vmem:[#allocation2] sm:$0xff] %v77_v48  ;;  %80 = vst [vmem:[#allocation2 + $0x8] sm:$0xff] %v78_v49 }
  0xa4   :  { %v83_v54 = vld [vmem:[#allocation2] ss:$8 sm:$0x3]  ;;  %v224_v18 = vld [vmem:[#allocation2 + $0x1] ss:$8 sm:$0x3] }
  0xa5   :  { %v345_v46 = vld [vmem:[#allocation2 + $0x2] ss:$8 sm:$0x3] }
  0xf9   :  { %v154_v50 = vpop.f32.mrb[0].mxu0 }
  0xfa   :  { %v156_v51 = vpop.f32.mrb[1].mxu0 }
  0xfb   :  { %v161_v52 = vcombine.low %v154_v50, %v156_v51 }
  0xfd   :  { %v168_v53 = vrot.slane %v161_v52, %v1337_v20 }
  0xff   :  { %v175_v55 = vrot.slane %v168_v53, %v1337_v20 }
 0x101   :  { %v177_v56 = vadd.f32 %v175_v55, %v83_v54 }
 0x103   :  { %1230 = vtanh.f32 %v177_v56 }
 0x10d   :  { %v1231_v57 = vpop.eup %1230 }
 0x10e   :  { %v179_v58 = vmul.f32 0.5, %v1231_v57  ;;  %v207_v60 = vrot.slane %v1231_v57, 1 }
 0x110   :  { %v180_v59 = vadd.f32 0.5, %v179_v58 }
 0x112   :  { %v209_v61 = vmul.f32 %v207_v60, %v180_v59  ;;  %v206_v63 = vmul.f32 %v204_v62, %v180_v59 }
 0x114   :  { %211 = vrot.lane.b32.xlu1 %v209_v61, %s1292_s0 }
 0x118   :  { %182 = vrot.lane.b32.xlu1 %v1231_v57, %s1292_s0 }
 0x186   :  { %v212_v1 = vpop.permute.xlu1 %211 }
 0x187   :  { %v214_v2 = vadd.f32 %v212_v1, %v206_v63 }
 0x189   :  { %1232 = vtanh.f32 %v214_v2 }
 0x18a   :  { %v183_v4 = vpop.permute.xlu1 %182 }
 0x18b   :  { %v184_v5 = vrot.slane %v183_v4, 1 }
 0x18d   :  { %v186_v6 = vmul.f32 0.5, %v184_v5  ;;  %v466_v5 = vld [vmem:[#allocation2 + $0x3] ss:$8 sm:$0x3] }
 0x18f   :  { %v187_v7 = vadd.f32 0.5, %v186_v6 }
 0x193   :  { %v1233_v3 = vpop.eup %1232 }
 0x194   :  { %217 = vrot.lane.b32.xlu0 %v1233_v3, %s1292_s0 }
 0x206   :  { %v218_v8 = vpop.permute.xlu0 %217 }
 0x207   :  { %v220_v9 = vmul.f32 %v218_v8, %v187_v7 }
 0x209   :  { %222 = vst.msk [vmem:[#allocation3] sm:$0x1] %vm221_vm1, %v220_v9  ;;  %1087 = vmatmul.mubr.msk.f32.vlgmr.msra.gmra.mrb[0].mxu1 %vm84_vm0, %v220_v9 }
 0x20a   :  { %1145 = vmatpush1.bf16.msra.mxu1 %v1331_v14  ;;  %534 = vmatprep.mubr.f32.mxu1 %v1289_v0 }
 0x20b   :  { %1147 = vmatprep.subr.bf16.mxu1 %v1333_v15 }
 0x20e   :  { %1149 = vmatpush1.bf16.msra.mxu1 %v1341_v21 }
 0x20f   :  { %1151 = vmatprep.subr.bf16.mxu1 %v1345_v22 }
 0x212   :  { %1153 = vmatpush1.bf16.msra.mxu1 %v1356_v30 }
 0x213   :  { %1155 = vmatprep.subr.bf16.mxu1 %v1360_v31 }
 0x216   :  { %1157 = vmatpush1.bf16.msra.mxu1 %v1366_v35 }
 0x217   :  { %1175 = vmatprep.subr.bf16.mxu1 %v1329_v10 }
 0x2dc   :  { %v294_v11 = vpop.f32.mrb[0].mxu1 }
 0x2dd   :  { %v296_v12 = vpop.f32.mrb[1].mxu1 }
 0x2de   :  { %v301_v13 = vcombine.low %v294_v11, %v296_v12 }
 0x2e0   :  { %v308_v16 = vrot.slane %v301_v13, %v1337_v20 }
 0x2e2   :  { %v315_v17 = vrot.slane %v308_v16, %v1337_v20 }
 0x2e4   :  { %v317_v19 = vadd.f32 %v315_v17, %v224_v18 }
 0x2e6   :  { %1234 = vtanh.f32 %v317_v19 }
 0x2f0   :  { %v1235_v23 = vpop.eup %1234 }
 0x2f1   :  { %322 = vrot.lane.b32.xlu0 %v1235_v23, %s1292_s0  ;;  %v319_v24 = vmul.f32 0.5, %v1235_v23  ;;  %v329_v26 = vrot.slane %v1235_v23, 1 }
 0x2f3   :  { %v320_v25 = vadd.f32 0.5, %v319_v24 }
 0x2f5   :  { %v331_v27 = vmul.f32 %v329_v26, %v320_v25  ;;  %v328_v28 = vmul.f32 %v320_v25, %v214_v2 }
 0x2f7   :  { %333 = vrot.lane.b32.xlu1 %v331_v27, %s1292_s0 }
 0x363   :  { %v323_v34 = vpop.permute.xlu0 %322 }
 0x364   :  { %v324_v36 = vrot.slane %v323_v34, 1  ;;  %v587_v34 = vld [vmem:[#allocation2 + $0x4] ss:$8 sm:$0x3] }
 0x366   :  { %v326_v37 = vmul.f32 0.5, %v324_v36 }
 0x368   :  { %v327_v38 = vadd.f32 0.5, %v326_v37 }
 0x369   :  { %v334_v29 = vpop.permute.xlu1 %333 }
 0x36a   :  { %v336_v32 = vadd.f32 %v334_v29, %v328_v28 }
 0x36c   :  { %1236 = vtanh.f32 %v336_v32 }
 0x376   :  { %v1237_v33 = vpop.eup %1236 }
 0x377   :  { %339 = vrot.lane.b32.xlu1 %v1237_v33, %s1292_s0 }
 0x3e9   :  { %v340_v39 = vpop.permute.xlu1 %339 }
 0x3ea   :  { %v342_v40 = vmul.f32 %v340_v39, %v327_v38 }
 0x3ec   :  { %343 = vst.msk [vmem:[#allocation3 + $0x1] sm:$0x1] %vm221_vm1, %v342_v40  ;;  %1088 = vmatmul.mubr.msk.f32.vlgmr.msra.gmra.mrb[2].mxu0 %vm84_vm0, %v342_v40 }
 0x3ed   :  { %1161 = vmatpush1.bf16.msra.mxu0 %v1331_v14  ;;  %655 = vmatprep.mubr.f32.mxu0 %v1289_v0 }
 0x3ee   :  { %1163 = vmatprep.subr.bf16.mxu0 %v1333_v15 }
 0x3f1   :  { %1165 = vmatpush1.bf16.msra.mxu0 %v1341_v21 }
 0x3f2   :  { %1167 = vmatprep.subr.bf16.mxu0 %v1345_v22 }
 0x3f5   :  { %1169 = vmatpush1.bf16.msra.mxu0 %v1356_v30 }
 0x3f6   :  { %1171 = vmatprep.subr.bf16.mxu0 %v1360_v31 }
 0x3f9   :  { %1173 = vmatpush1.bf16.msra.mxu0 %v1366_v35 }
 0x3fa   :  { %1191 = vmatprep.subr.bf16.mxu0 %v1329_v10 }
 0x4bf   :  { %v415_v41 = vpop.f32.mrb[2].mxu0 }
 0x4c0   :  { %v417_v42 = vpop.f32.mrb[3].mxu0 }
 0x4c1   :  { %v422_v43 = vcombine.low %v415_v41, %v417_v42 }
 0x4c3   :  { %v429_v44 = vrot.slane %v422_v43, %v1337_v20 }
 0x4c5   :  { %v436_v45 = vrot.slane %v429_v44, %v1337_v20 }
 0x4c7   :  { %v438_v47 = vadd.f32 %v436_v45, %v345_v46 }
 0x4c9   :  { %1238 = vtanh.f32 %v438_v47 }
 0x4d3   :  { %v1239_v48 = vpop.eup %1238 }
 0x4d4   :  { %443 = vrot.lane.b32.xlu1 %v1239_v48, %s1292_s0  ;;  %v440_v49 = vmul.f32 0.5, %v1239_v48  ;;  %v450_v51 = vrot.slane %v1239_v48, 1 }
 0x4d6   :  { %v441_v50 = vadd.f32 0.5, %v440_v49 }
 0x4d8   :  { %v452_v52 = vmul.f32 %v450_v51, %v441_v50  ;;  %v449_v53 = vmul.f32 %v441_v50, %v336_v32 }
 0x4da   :  { %454 = vrot.lane.b32.xlu0 %v452_v52, %s1292_s0 }
 0x546   :  { %v444_v57 = vpop.permute.xlu1 %443 }
 0x547   :  { %v445_v58 = vrot.slane %v444_v57, 1 }
 0x549   :  { %v447_v59 = vmul.f32 0.5, %v445_v58 }
 0x54b   :  { %v448_v60 = vadd.f32 0.5, %v447_v59 }
 0x54c   :  { %v455_v54 = vpop.permute.xlu0 %454 }
 0x54d   :  { %v457_v55 = vadd.f32 %v455_v54, %v449_v53 }
 0x54f   :  { %1240 = vtanh.f32 %v457_v55 }
 0x559   :  { %v1241_v56 = vpop.eup %1240 }
 0x55a   :  { %460 = vrot.lane.b32.xlu0 %v1241_v56, %s1292_s0 }
 0x5cc   :  { %v461_v61 = vpop.permute.xlu0 %460 }
 0x5cd   :  { %v463_v62 = vmul.f32 %v461_v61, %v448_v60 }
 0x5cf   :  { %464 = vst.msk [vmem:[#allocation3 + $0x2] sm:$0x1] %vm221_vm1, %v463_v62  ;;  %1089 = vmatmul.mubr.msk.f32.vlgmr.msra.gmra.mrb[2].mxu1 %vm84_vm0, %v463_v62 }
 0x5d0   :  { %1177 = vmatpush1.bf16.msra.mxu1 %v1331_v14  ;;  %776 = vmatprep.mubr.f32.mxu1 %v1289_v0 }
 0x5d1   :  { %1179 = vmatprep.subr.bf16.mxu1 %v1333_v15 }
 0x5d4   :  { %1181 = vmatpush1.bf16.msra.mxu1 %v1341_v21 }
 0x5d5   :  { %1183 = vmatprep.subr.bf16.mxu1 %v1345_v22 }
 0x5d8   :  { %1185 = vmatpush1.bf16.msra.mxu1 %v1356_v30 }
 0x5d9   :  { %1187 = vmatprep.subr.bf16.mxu1 %v1360_v31 }
 0x5dc   :  { %1189 = vmatpush1.bf16.msra.mxu1 %v1366_v35 }
 0x5dd   :  { %1207 = vmatprep.subr.bf16.mxu1 %v1329_v10 }
 0x6a2   :  { %v536_v63 = vpop.f32.mrb[2].mxu1 }
 0x6a3   :  { %v538_v1 = vpop.f32.mrb[3].mxu1 }
 0x6a4   :  { %v543_v2 = vcombine.low %v536_v63, %v538_v1 }
 0x6a6   :  { %v550_v3 = vrot.slane %v543_v2, %v1337_v20 }
 0x6a8   :  { %v557_v4 = vrot.slane %v550_v3, %v1337_v20 }
 0x6aa   :  { %v559_v6 = vadd.f32 %v557_v4, %v466_v5 }
 0x6ac   :  { %1242 = vtanh.f32 %v559_v6 }
 0x6b6   :  { %v1243_v7 = vpop.eup %1242 }
 0x6b7   :  { %564 = vrot.lane.b32.xlu0 %v1243_v7, %s1292_s0  ;;  %v561_v8 = vmul.f32 0.5, %v1243_v7  ;;  %v571_v11 = vrot.slane %v1243_v7, 1 }
 0x6b9   :  { %v562_v9 = vadd.f32 0.5, %v561_v8  ;;  %v829_v8 = vld [vmem:[#allocation2 + $0x6] ss:$8 sm:$0x3] }
 0x6bb   :  { %v573_v12 = vmul.f32 %v571_v11, %v562_v9  ;;  %v570_v10 = vmul.f32 %v562_v9, %v457_v55 }
 0x6bd   :  { %575 = vrot.lane.b32.xlu1 %v573_v12, %s1292_s0 }
 0x729   :  { %v565_v18 = vpop.permute.xlu0 %564 }
 0x72a   :  { %v566_v19 = vrot.slane %v565_v18, 1 }
 0x72c   :  { %v568_v23 = vmul.f32 0.5, %v566_v19 }
 0x72e   :  { %v569_v24 = vadd.f32 0.5, %v568_v23 }
 0x72f   :  { %v576_v13 = vpop.permute.xlu1 %575 }
 0x730   :  { %v578_v16 = vadd.f32 %v576_v13, %v570_v10 }
 0x732   :  { %1244 = vtanh.f32 %v578_v16 }
 0x73c   :  { %v1245_v17 = vpop.eup %1244 }
 0x73d   :  { %581 = vrot.lane.b32.xlu1 %v1245_v17, %s1292_s0 }
 0x7af   :  { %v582_v25 = vpop.permute.xlu1 %581 }
 0x7b0   :  { %v584_v26 = vmul.f32 %v582_v25, %v569_v24 }
 0x7b2   :  { %585 = vst.msk [vmem:[#allocation3 + $0x3] sm:$0x1] %vm221_vm1, %v584_v26  ;;  %1090 = vmatmul.mubr.msk.f32.vlgmr.msra.gmra.mrb[4].mxu0 %vm84_vm0, %v584_v26 }
 0x7b3   :  { %1193 = vmatpush1.bf16.msra.mxu0 %v1331_v14  ;;  %897 = vmatprep.mubr.f32.mxu0 %v1289_v0 }
 0x7b4   :  { %1195 = vmatprep.subr.bf16.mxu0 %v1333_v15 }
 0x7b7   :  { %1197 = vmatpush1.bf16.msra.mxu0 %v1341_v21 }
 0x7b8   :  { %1199 = vmatprep.subr.bf16.mxu0 %v1345_v22 }
 0x7bb   :  { %1201 = vmatpush1.bf16.msra.mxu0 %v1356_v30 }
 0x7bc   :  { %1203 = vmatprep.subr.bf16.mxu0 %v1360_v31 }
 0x7bf   :  { %1205 = vmatpush1.bf16.msra.mxu0 %v1366_v35 }
 0x885   :  { %v657_v27 = vpop.f32.mrb[4].mxu0 }
 0x886   :  { %v659_v28 = vpop.f32.mrb[5].mxu0 }
 0x887   :  { %v664_v29 = vcombine.low %v657_v27, %v659_v28 }
 0x889   :  { %v671_v32 = vrot.slane %v664_v29, %v1337_v20 }
 0x88b   :  { %v678_v33 = vrot.slane %v671_v32, %v1337_v20 }
 0x88d   :  { %v680_v36 = vadd.f32 %v678_v33, %v587_v34 }
 0x88f   :  { %1246 = vtanh.f32 %v680_v36 }
 0x899   :  { %v1247_v37 = vpop.eup %1246 }
 0x89a   :  { %685 = vrot.lane.b32.xlu1 %v1247_v37, %s1292_s0  ;;  %v682_v38 = vmul.f32 0.5, %v1247_v37  ;;  %v692_v40 = vrot.slane %v1247_v37, 1 }
 0x89c   :  { %v683_v39 = vadd.f32 0.5, %v682_v38  ;;  %v950_v38 = vld [vmem:[#allocation2 + $0x7] ss:$8 sm:$0x3] }
 0x89e   :  { %v694_v41 = vmul.f32 %v692_v40, %v683_v39  ;;  %v691_v42 = vmul.f32 %v683_v39, %v578_v16 }
 0x8a0   :  { %696 = vrot.lane.b32.xlu0 %v694_v41, %s1292_s0 }
 0x90c   :  { %v686_v46 = vpop.permute.xlu1 %685 }
 0x90d   :  { %v687_v47 = vrot.slane %v686_v46, 1 }
 0x90f   :  { %v689_v48 = vmul.f32 0.5, %v687_v47 }
 0x911   :  { %v690_v49 = vadd.f32 0.5, %v689_v48 }
 0x912   :  { %v697_v43 = vpop.permute.xlu0 %696 }
 0x913   :  { %v699_v44 = vadd.f32 %v697_v43, %v691_v42 }
 0x915   :  { %1248 = vtanh.f32 %v699_v44 }
 0x91f   :  { %v1249_v45 = vpop.eup %1248 }
 0x920   :  { %702 = vrot.lane.b32.xlu0 %v1249_v45, %s1292_s0 }
 0x992   :  { %v703_v50 = vpop.permute.xlu0 %702 }
 0x993   :  { %v705_v51 = vmul.f32 %v703_v50, %v690_v49 }
 0x995   :  { %706 = vst.msk [vmem:[#allocation3 + $0x4] sm:$0x1] %vm221_vm1, %v705_v51  ;;  %1091 = vmatmul.mubr.msk.f32.vlgmr.msra.gmra.mrb[4].mxu1 %vm84_vm0, %v705_v51 }
 0x996   :  { %1209 = vmatpush1.bf16.msra.mxu1 %v1331_v14  ;;  %1018 = vmatprep.mubr.f32.mxu1 %v1289_v0  ;;  %v708_v0 = vld [vmem:[#allocation2 + $0x5] ss:$8 sm:$0x3] }
 0x997   :  { %1211 = vmatprep.subr.bf16.mxu1 %v1333_v15 }
 0x99a   :  { %1213 = vmatpush1.bf16.msra.mxu1 %v1341_v21 }
 0x99b   :  { %1215 = vmatprep.subr.bf16.mxu1 %v1345_v22 }
 0x99e   :  { %1217 = vmatpush1.bf16.msra.mxu1 %v1356_v30 }
 0x99f   :  { %1219 = vmatprep.subr.bf16.mxu1 %v1360_v31 }
 0x9a2   :  { %1221 = vmatpush1.bf16.msra.mxu1 %v1366_v35 }
 0xa68   :  { %v778_v52 = vpop.f32.mrb[4].mxu1 }
 0xa69   :  { %v780_v53 = vpop.f32.mrb[5].mxu1 }
 0xa6a   :  { %v785_v54 = vcombine.low %v778_v52, %v780_v53 }
 0xa6c   :  { %v792_v55 = vrot.slane %v785_v54, %v1337_v20  ;;  %v1070_v54 = vld [vmem:[%s1506_s2 + $0x4] ss:$0 sm:$0xff] }
 0xa6e   :  { %v799_v14 = vrot.slane %v792_v55, %v1337_v20 }
 0xa70   :  { %v801_v56 = vadd.f32 %v799_v14, %v708_v0 }
 0xa72   :  { %1250 = vtanh.f32 %v801_v56  ;;  %v1071_v56 = vld [vmem:[%s1506_s2 + $0x5] ss:$0 sm:$0xff] }
 0xa7c   :  { %v1251_v15 = vpop.eup %1250 }
 0xa7d   :  { %806 = vrot.lane.b32.xlu0 %v1251_v15, %s1292_s0  ;;  %v803_v21 = vmul.f32 0.5, %v1251_v15  ;;  %v813_v30 = vrot.slane %v1251_v15, 1 }
 0xa7f   :  { %v804_v22 = vadd.f32 0.5, %v803_v21 }
 0xa81   :  { %v815_v57 = vmul.f32 %v813_v30, %v804_v22  ;;  %v812_v31 = vmul.f32 %v804_v22, %v699_v44 }
 0xa83   :  { %817 = vrot.lane.b32.xlu1 %v815_v57, %s1292_s0 }
 0xaef   :  { %v807_v60 = vpop.permute.xlu0 %806 }
 0xaf0   :  { %v808_v61 = vrot.slane %v807_v60, 1 }
 0xaf2   :  { %v810_v62 = vmul.f32 0.5, %v808_v61 }
 0xaf4   :  { %v811_v63 = vadd.f32 0.5, %v810_v62 }
 0xaf5   :  { %v818_v35 = vpop.permute.xlu1 %817 }
 0xaf6   :  { %v820_v58 = vadd.f32 %v818_v35, %v812_v31 }
 0xaf8   :  { %1252 = vtanh.f32 %v820_v58 }
 0xb02   :  { %v1253_v59 = vpop.eup %1252 }
 0xb03   :  { %823 = vrot.lane.b32.xlu1 %v1253_v59, %s1292_s0 }
 0xb75   :  { %v824_v1 = vpop.permute.xlu1 %823 }
 0xb76   :  { %v826_v2 = vmul.f32 %v824_v1, %v811_v63 }
 0xb78   :  { %827 = vst.msk [vmem:[#allocation3 + $0x5] sm:$0x1] %vm221_vm1, %v826_v2  ;;  %1092 = vmatmul.mubr.msk.f32.vlgmr.msra.gmra.mrb[6].mxu0 %vm84_vm0, %v826_v2 }
 0xc4b   :  { %v899_v3 = vpop.f32.mrb[6].mxu0 }
 0xc4c   :  { %v901_v4 = vpop.f32.mrb[7].mxu0 }
 0xc4d   :  { %v906_v5 = vcombine.low %v899_v3, %v901_v4 }
 0xc4f   :  { %v913_v6 = vrot.slane %v906_v5, %v1337_v20 }
 0xc51   :  { %v920_v7 = vrot.slane %v913_v6, %v1337_v20 }
 0xc53   :  { %v922_v9 = vadd.f32 %v920_v7, %v829_v8 }
 0xc55   :  { %1254 = vtanh.f32 %v922_v9 }
 0xc5f   :  { %v1255_v11 = vpop.eup %1254 }
 0xc60   :  { %927 = vrot.lane.b32.xlu1 %v1255_v11, %s1292_s0  ;;  %v924_v12 = vmul.f32 0.5, %v1255_v11  ;;  %v934_v13 = vrot.slane %v1255_v11, 1 }
 0xc62   :  { %v925_v10 = vadd.f32 0.5, %v924_v12 }
 0xc64   :  { %v936_v16 = vmul.f32 %v934_v13, %v925_v10  ;;  %v933_v17 = vmul.f32 %v925_v10, %v820_v58 }
 0xc66   :  { %938 = vrot.lane.b32.xlu0 %v936_v16, %s1292_s0 }
 0xcd2   :  { %v928_v24 = vpop.permute.xlu1 %927 }
 0xcd3   :  { %v929_v25 = vrot.slane %v928_v24, 1 }
 0xcd5   :  { %v931_v26 = vmul.f32 0.5, %v929_v25 }
 0xcd7   :  { %v932_v27 = vadd.f32 0.5, %v931_v26 }
 0xcd8   :  { %v939_v18 = vpop.permute.xlu0 %938 }
 0xcd9   :  { %v941_v19 = vadd.f32 %v939_v18, %v933_v17 }
 0xcdb   :  { %1256 = vtanh.f32 %v941_v19 }
 0xce5   :  { %v1257_v23 = vpop.eup %1256 }
 0xce6   :  { %944 = vrot.lane.b32.xlu0 %v1257_v23, %s1292_s0 }
 0xd58   :  { %v945_v28 = vpop.permute.xlu0 %944 }
 0xd59   :  { %v947_v29 = vmul.f32 %v945_v28, %v932_v27 }
 0xd5b   :  { %948 = vst.msk [vmem:[#allocation3 + $0x6] sm:$0x1] %vm221_vm1, %v947_v29  ;;  %1093 = vmatmul.mubr.msk.f32.vlgmr.msra.gmra.mrb[6].mxu1 %vm84_vm0, %v947_v29 }
 0xe2e   :  { %v1020_v32 = vpop.f32.mrb[6].mxu1 }
 0xe2f   :  { %v1022_v33 = vpop.f32.mrb[7].mxu1 }
 0xe30   :  { %v1027_v34 = vcombine.low %v1020_v32, %v1022_v33 }
 0xe32   :  { %v1034_v36 = vrot.slane %v1027_v34, %v1337_v20 }
 0xe34   :  { %v1041_v37 = vrot.slane %v1034_v36, %v1337_v20 }
 0xe36   :  { %v1043_v39 = vadd.f32 %v1041_v37, %v950_v38 }
 0xe38   :  { %1258 = vtanh.f32 %v1043_v39 }
 0xe42   :  { %v1259_v40 = vpop.eup %1258 }
 0xe43   :  { %1048 = vrot.lane.b32.xlu0 %v1259_v40, %s1292_s0  ;;  %v1045_v41 = vmul.f32 0.5, %v1259_v40  ;;  %v1055_v43 = vrot.slane %v1259_v40, 1 }
 0xe45   :  { %v1046_v42 = vadd.f32 0.5, %v1045_v41 }
 0xe47   :  { %v1057_v44 = vmul.f32 %v1055_v43, %v1046_v42  ;;  %v1054_v45 = vmul.f32 %v1046_v42, %v941_v19 }
 0xe49   :  { %1059 = vrot.lane.b32.xlu1 %v1057_v44, %s1292_s0 }
 0xeb5   :  { %v1049_v20 = vpop.permute.xlu0 %1048 }
 0xeb6   :  { %v1050_v49 = vrot.slane %v1049_v20, 1 }
 0xeb8   :  { %v1052_v50 = vmul.f32 0.5, %v1050_v49 }
 0xeba   :  { %v1053_v51 = vadd.f32 0.5, %v1052_v50 }
 0xebb   :  { %v1060_v46 = vpop.permute.xlu1 %1059 }
 0xebc   :  { %v1062_v47 = vadd.f32 %v1060_v46, %v1054_v45 }
 0xebe   :  { %1260 = vtanh.f32 %v1062_v47 }
 0xec8   :  { %v1261_v48 = vpop.eup %1260 }
 0xec9   :  { %1065 = vrot.lane.b32.xlu1 %v1261_v48, %s1292_s0 }
 0xf3b   :  { %v1066_v52 = vpop.permute.xlu1 %1065 }
 0xf3c   :  { %v1068_v53 = vmul.f32 %v1066_v52, %v1053_v51 }
 0xf3e   :  { %1069 = vst.msk [vmem:[#allocation3 + $0x7] sm:$0x1] %vm221_vm1, %v1068_v53 }
 0xf45   :  { %v1072_v55 = vld [vmem:[#allocation3] sm:$0xff] }
 0xf46   :  { %v1073_v14 = vmul.f32 %v1072_v55, %v1070_v54 }
 0xf48   :  { %v1074_v0 = vsel %vm84_vm0, %v1073_v14, 0.0 }
 0xf49   :  { %1075 = vadd.xlane.f32.xlu0 %v1074_v0 }
 0xfd6   :  { %v1076_v15 = vpop.xlane.xlu0 %1075 }
 0xfd7   :  { %v1077_v21 = vadd.f32 %v1076_v15, %v1071_v56 }
 0xfd9   :  { %1079 = vst.msk [vmem:[%s1507_s3] sm:$0xff] %vm1078_vm2, %v1077_v21 }
 0xfda   :  { %1084 = vsyncpa [#allocation5], 1 }

</bundles_post_ra>
